<compile_context>
chip_gen: v7x
topology: tpu7x:2x2x1
jax: 0.10.0
libtpu: 0.0.40
codegen_flags: <defaults>
</compile_context>

<pallas_src>
import jax
import jax.numpy as jnp
from jax import lax
from jax.experimental import pallas as pl
from jax.experimental.pallas import tpu as pltpu

_EPS = 1e-12  # torch.nn.functional.normalize default eps

# Contract dim 1 (D) of the activations with dim 1 of the (H, D) PyTorch-layout
# weight: computes diff @ W.T with no transpose materialized anywhere.
_CONTRACT_DIM1 = (((1,), (1,)), ((), ()))


def _normalize_diff(x1, x2):
    # F.normalize(x, p=2, dim=1): x / max(||x||, eps) == x * rsqrt(max(sumsq, eps^2))
    inv1 = lax.rsqrt(jnp.maximum(jnp.sum(x1 * x1, axis=1, keepdims=True), _EPS * _EPS))
    inv2 = lax.rsqrt(jnp.maximum(jnp.sum(x2 * x2, axis=1, keepdims=True), _EPS * _EPS))
    return x1 * inv1 - x2 * inv2


def _head_small_kernel(x1_ref, x2_ref, w1_ref, b1_ref, w2_ref, b2_ref, o_ref):
    # x1/x2: (B, D) f32 VMEM; w1: (H, D) bf16 VMEM (PyTorch layout); b1: (1, H) f32;
    # w2: (1, H) f32; b2: (1,) f32 SMEM (scalar path); o: (B, 1) f32.
    diff = _normalize_diff(x1_ref[...], x2_ref[...])                     # (B, D) f32
    # fc[0]: Linear(512->128) + ReLU — bf16 MXU feed, f32 accumulation, no transpose.
    h = lax.dot_general(diff.astype(jnp.bfloat16), w1_ref[...],
                        dimension_numbers=_CONTRACT_DIM1,
                        preferred_element_type=jnp.float32) + b1_ref[...]
    h = jnp.maximum(h, 0.0)                                              # (B, H)
    # fc[2]: Linear(128->1) — broadcast-mul + lane reduction; do not waste the MXU
    # on an N=1 matmul (v5e note).
    logits = jnp.sum(h * w2_ref[...], axis=1, keepdims=True) + b2_ref[0]  # (B, 1)
    o_ref[...] = jax.nn.sigmoid(logits)


def _head_tiled_kernel(x1_ref, x2_ref, w1_ref, b1_ref, w2_ref, b2_ref, o_ref):
    # Per grid step: x1/x2: (bt, D) f32; w1: (H, D) bf16 (resident, constant map);
    # b1/w2: (1, H) f32; b2: (1,) f32 SMEM; o: (1, bt) f32 — lane-dense output block.
    diff = _normalize_diff(x1_ref[...], x2_ref[...])                     # (bt, D)
    h = lax.dot_general(diff.astype(jnp.bfloat16), w1_ref[...],
                        dimension_numbers=_CONTRACT_DIM1,
                        preferred_element_type=jnp.float32) + b1_ref[...]
    h = jnp.maximum(h, 0.0)                                              # (bt, H)
    # fc[2] as (1,H) x (bt,H)^T -> (1, bt): the result already sits lane-dense so
    # the writeback is an unmasked vst instead of a (bt,1) column of vst.msk.
    logits = lax.dot_general(w2_ref[...], h, dimension_numbers=_CONTRACT_DIM1,
                             preferred_element_type=jnp.float32) + b2_ref[0]
    o_ref[...] = jax.nn.sigmoid(logits)


def prepare_params(fc1_w, fc1_b, fc2_w, fc2_b):
    """One-time parameter prep (call once, outside the hot path).

    fc1_w stays in its PyTorch (128, 512) layout — no transpose — and is cast
    to bf16 once to halve the only non-trivial DMA (the 256 KiB fc1 weight).
    """
    H = fc1_w.shape[0]
    return dict(
        w1=fc1_w.astype(jnp.bfloat16),                 # (H, D) bf16, PyTorch layout
        b1=fc1_b.reshape(1, H).astype(jnp.float32),    # (1, H)
        w2=fc2_w.reshape(1, H).astype(jnp.float32),    # (1, H)
        b2=fc2_b.reshape(1).astype(jnp.float32),       # (1,) -> SMEM scalar path
    )


def logistic_siamese_regression(x1, x2, params, *, block_b=256):
    """Pallas forward of the LogisticSiameseRegression head.

    x1, x2 : (B, 512) embeddings (embedding_model outputs).
    params : output of prepare_params().
    Returns (B, 1) f32 sigmoid probabilities.
    """
    B, D = x1.shape
    H = params["w1"].shape[0]
    x1 = x1.astype(jnp.float32)
    x2 = x2.astype(jnp.float32)

    vmem = pl.BlockSpec(memory_space=pltpu.MemorySpace.VMEM)
    smem = pl.BlockSpec(memory_space=pltpu.MemorySpace.SMEM)

    cost = pl.CostEstimate(
        flops=2 * B * D * H + 2 * B * H + 6 * B * D,
        transcendentals=3 * B,                                   # 2 rsqrt + 1 sigmoid per row
        bytes_accessed=2 * B * D * 4 + H * D * 2 + 2 * H * 4 + B * 4,
    )

    args = (x1, x2, params["w1"], params["b1"], params["w2"], params["b2"])

    if B < block_b or B % block_b != 0:
        # Small-B path: the whole problem (~200 KiB) fits in VMEM on all
        # generations; any grid would be pure per-step pipeline overhead.
        return pl.pallas_call(
            _head_small_kernel,
            out_shape=jax.ShapeDtypeStruct((B, 1), jnp.float32),
            in_specs=[vmem, vmem, vmem, vmem, vmem, smem],
            out_specs=vmem,
            cost_estimate=cost,
        )(*args)

    # Large-B path: batch grid (shards across both v7x TensorCores), resident
    # weights, lane-dense (1, B) output reshaped to (B, 1) in the wrapper.
    nb = B // block_b
    out = pl.pallas_call(
        _head_tiled_kernel,
        out_shape=jax.ShapeDtypeStruct((1, B), jnp.float32),
        grid=(nb,),
        in_specs=[
            pl.BlockSpec((block_b, D), lambda i: (i, 0)),
            pl.BlockSpec((block_b, D), lambda i: (i, 0)),
            pl.BlockSpec((H, D), lambda i: (0, 0)),        # weight stays resident
            pl.BlockSpec((1, H), lambda i: (0, 0)),
            pl.BlockSpec((1, H), lambda i: (0, 0)),
            smem,
        ],
        out_specs=pl.BlockSpec((1, block_b), lambda i: (0, i)),
        compiler_params=pltpu.CompilerParams(dimension_semantics=("parallel",)),
        cost_estimate=cost,
    )(*args)
    return out.reshape(B, 1)


def reference(x1, x2, fc1_w, fc1_b, fc2_w, fc2_b):
    # Pure-JAX, f32 reference of the PyTorch forward (normalize -> diff -> fc -> sigmoid).
    def l2norm(x):
        n = jnp.sqrt(jnp.sum(x * x, axis=1, keepdims=True))
        return x / jnp.maximum(n, _EPS)

    diff = l2norm(x1) - l2norm(x2)
    h = jnp.maximum(diff @ fc1_w.T + fc1_b, 0.0)
    return jax.nn.sigmoid(h @ fc2_w.T + fc2_b)


if __name__ == "__main__":
    key = jax.random.PRNGKey(0)
    k1, k2, k3, k4, kw1, kb1, kw2, kb2 = jax.random.split(key, 8)

    D, H = 512, 128  # fixed by the module's fc head

    # Deterministic Linear(512,128) / Linear(128,1) params in PyTorch layouts.
    fc1_w = jax.random.normal(kw1, (H, D), dtype=jnp.float32) * (1.0 / jnp.sqrt(D))
    fc1_b = jax.random.normal(kb1, (H,), dtype=jnp.float32) * 0.1
    fc2_w = jax.random.normal(kw2, (1, H), dtype=jnp.float32) * (1.0 / jnp.sqrt(H))
    fc2_b = jax.random.normal(kb2, (1,), dtype=jnp.float32) * 0.1

    params = prepare_params(fc1_w, fc1_b, fc2_w, fc2_b)   # one-time, outside hot path

    # --- Small-batch path (B=2): single ungridded call. ---
    # TODO(synk): embedding_model is an arbitrary user-supplied backbone; x1/x2
    # stand in for its (B, 512) outputs.
    B = 2
    x1 = jax.random.normal(k1, (B, D), dtype=jnp.float32)
    x2 = jax.random.normal(k2, (B, D), dtype=jnp.float32)
    out = jax.block_until_ready(logistic_siamese_regression(x1, x2, params))
    ref = reference(x1, x2, fc1_w, fc1_b, fc2_w, fc2_b)
    assert out.shape == (B, 1)
    # Tolerance covers the bf16 MXU feed (weights + diff); accumulation is f32.
    assert float(jnp.max(jnp.abs(out - ref))) < 2e-3, "small-batch mismatch vs reference"

    # --- Large-batch path (B=512): batch grid + lane-dense output. ---
    Bl = 512
    x1l = jax.random.normal(k3, (Bl, D), dtype=jnp.float32)
    x2l = jax.random.normal(k4, (Bl, D), dtype=jnp.float32)
    outl = jax.block_until_ready(logistic_siamese_regression(x1l, x2l, params))
    refl = reference(x1l, x2l, fc1_w, fc1_b, fc2_w, fc2_b)
    assert outl.shape == (Bl, 1)
    assert float(jnp.max(jnp.abs(outl - refl))) < 2e-3, "large-batch mismatch vs reference"

    print("KERNEL_OK")
</pallas_src>

<mosaic_0001>
module attributes {stable_mosaic.version = 11 : i64} {
  func.func @_head_small_kernel(%arg0: memref<2x512xf32, #tpu.memory_space<vmem>>, %arg1: memref<2x512xf32, #tpu.memory_space<vmem>>, %arg2: memref<128x512xbf16, #tpu.memory_space<vmem>>, %arg3: memref<1x128xf32, #tpu.memory_space<vmem>>, %arg4: memref<1x128xf32, #tpu.memory_space<vmem>>, %arg5: memref<1xf32, #tpu.memory_space<smem>>, %arg6: memref<2x1xf32, #tpu.memory_space<vmem>>) attributes {dimension_semantics = [], scalar_prefetch = 0 : i64, scratch_operands = 0 : i64, tpu.core_type = #tpu.core_type<tc>} {
    %c0 = arith.constant 0 : index
    %c0_0 = arith.constant 0 : index
    %0 = vector.load %arg0[%c0, %c0_0] : memref<2x512xf32, #tpu.memory_space<vmem>>, vector<2x512xf32>
    %c0_1 = arith.constant 0 : index
    %c0_2 = arith.constant 0 : index
    %1 = vector.load %arg1[%c0_1, %c0_2] : memref<2x512xf32, #tpu.memory_space<vmem>>, vector<2x512xf32>
    %2 = arith.mulf %0, %0 : vector<2x512xf32>
    %cst = arith.constant dense<0.000000e+00> : vector<2xf32>
    %3 = vector.multi_reduction <add>, %2, %cst [1] : vector<2x512xf32> to vector<2xf32>
    %4 = vector.shape_cast %3 : vector<2xf32> to vector<2x1xf32>
    %cst_3 = arith.constant 1.000000e-24 : f32
    %5 = vector.broadcast %cst_3 : f32 to vector<2x1xf32>
    %6 = arith.maximumf %4, %5 : vector<2x1xf32>
    %7 = math.rsqrt %6 : vector<2x1xf32>
    %8 = arith.mulf %1, %1 : vector<2x512xf32>
    %cst_4 = arith.constant dense<0.000000e+00> : vector<2xf32>
    %9 = vector.multi_reduction <add>, %8, %cst_4 [1] : vector<2x512xf32> to vector<2xf32>
    %10 = vector.shape_cast %9 : vector<2xf32> to vector<2x1xf32>
    %cst_5 = arith.constant 1.000000e-24 : f32
    %11 = vector.broadcast %cst_5 : f32 to vector<2x1xf32>
    %12 = arith.maximumf %10, %11 : vector<2x1xf32>
    %13 = math.rsqrt %12 : vector<2x1xf32>
    %14 = vector.broadcast %7 : vector<2x1xf32> to vector<2x512xf32>
    %15 = arith.mulf %0, %14 : vector<2x512xf32>
    %16 = vector.broadcast %13 : vector<2x1xf32> to vector<2x512xf32>
    %17 = arith.mulf %1, %16 : vector<2x512xf32>
    %18 = arith.subf %15, %17 : vector<2x512xf32>
    %19 = arith.truncf %18 : vector<2x512xf32> to vector<2x512xbf16>
    %c0_6 = arith.constant 0 : index
    %c0_7 = arith.constant 0 : index
    %20 = vector.load %arg2[%c0_6, %c0_7] : memref<128x512xbf16, #tpu.memory_space<vmem>>, vector<128x512xbf16>
    %cst_8 = arith.constant dense<0.000000e+00> : vector<2x128xf32>
    %21 = tpu.matmul %19, %20, %cst_8 {dimension_numbers = #tpu.dot_dimension_numbers<[1], [1], [0], [0], [0, 0, 1, 0], [], []>} : vector<2x512xbf16>, vector<128x512xbf16>, vector<2x128xf32> -> vector<2x128xf32>
    %c0_9 = arith.constant 0 : index
    %c0_10 = arith.constant 0 : index
    %22 = vector.load %arg3[%c0_9, %c0_10] : memref<1x128xf32, #tpu.memory_space<vmem>>, vector<1x128xf32>
    %23 = vector.broadcast %22 : vector<1x128xf32> to vector<2x128xf32>
    %24 = arith.addf %21, %23 : vector<2x128xf32>
    %cst_11 = arith.constant 0.000000e+00 : f32
    %25 = vector.broadcast %cst_11 : f32 to vector<2x128xf32>
    %26 = arith.maximumf %24, %25 : vector<2x128xf32>
    %c0_12 = arith.constant 0 : index
    %c0_13 = arith.constant 0 : index
    %27 = vector.load %arg4[%c0_12, %c0_13] : memref<1x128xf32, #tpu.memory_space<vmem>>, vector<1x128xf32>
    %28 = vector.broadcast %27 : vector<1x128xf32> to vector<2x128xf32>
    %29 = arith.mulf %26, %28 : vector<2x128xf32>
    %cst_14 = arith.constant dense<0.000000e+00> : vector<2xf32>
    %30 = vector.multi_reduction <add>, %29, %cst_14 [1] : vector<2x128xf32> to vector<2xf32>
    %31 = vector.shape_cast %30 : vector<2xf32> to vector<2x1xf32>
    %c0_15 = arith.constant 0 : index
    %32 = memref.load %arg5[%c0_15] : memref<1xf32, #tpu.memory_space<smem>>
    %33 = vector.broadcast %32 : f32 to vector<2x1xf32>
    %34 = arith.addf %31, %33 : vector<2x1xf32>
    %35 = arith.negf %34 : vector<2x1xf32>
    %36 = math.exp %35 : vector<2x1xf32>
    %cst_16 = arith.constant 1.000000e+00 : f32
    %37 = vector.broadcast %cst_16 : f32 to vector<2x1xf32>
    %38 = arith.addf %37, %36 : vector<2x1xf32>
    %39 = arith.divf %37, %38 : vector<2x1xf32>
    %c0_17 = arith.constant 0 : index
    %c0_18 = arith.constant 0 : index
    %40 = vector.load %arg6[%c0_17, %c0_18] : memref<2x1xf32, #tpu.memory_space<vmem>>, vector<2x1xf32>
    tpu.vector_store %arg6[%c0_17, %c0_18], %39 {strides = array<i32>} : memref<2x1xf32, #tpu.memory_space<vmem>>, vector<2x1xf32>,
    return
  }
}

</mosaic_0001>

<bundles_post_ra>
// kernel: tpu_custom_call.1
= control target key start
LH: loop header
LB: loop body
LE: loop exit
PB: predicated region body
PF: predicated region fallthrough
CT: control target
= control target key end

     0   :  { %12 = vsyncpa [#allocation4], 0  ;;  %s779_s0 = inlined_call_operand.hbm [shape: f32[2,512], index: 0, kind: input, shape index: {}]   ;;  %s780_s1 = inlined_call_operand.hbm [shape: f32[2,512], index: 1, kind: input, shape index: {}]   ;;  %s781_s2 = inlined_call_operand.hbm [shape: bf16[128,512], index: 2, kind: input, shape index: {}]   ;;  %s782_s3 = inlined_call_operand.vmem [shape: f32[1,128], index: 3, kind: input, shape index: {}]   ;;  %s783_s4 = inlined_call_operand.vmem [shape: f32[1,128], index: 4, kind: input, shape index: {}]   ;;  %s784_s5 = inlined_call_operand.<no memory space> [shape: f32[1], index: 5, kind: input, shape index: {}]   ;;  %s785_s6 = inlined_call_operand.vmem [shape: f32[2,1], index: 6, kind: output, shape index: {}]  }
   0x1   :  { %13 = vsyncpa [#allocation6], 0  ;;  %s658_s21 = smov [#allocation5]   ;;  %s659_s23 = smov [#allocation3]  }
   0x2   :  { %s30_s22 = sshll.u32 %s658_s21, 4  ;;  %s20_s24 = sshll.u32 %s659_s23, 4  ;;  %s31_s22 = int_to_ptr.vmem [resolvable:$true] %s30_s22  ;;  %s21_s24 = int_to_ptr.vmem [resolvable:$true] %s20_s24 }
   0x3   :  { %s588_s27 = scalar_lea.hbm %s780_s1, 128 }
   0x4   :  { %p589_p0 = scmp.ne.s32.totalorder %s780_s1, %s588_s27  ;;  %p592_p1 = scmp.lt.u32.totalorder %s588_s27, %s780_s1 }
   0x6   :  { %p594_p2 = pnand %p592_p1, %p589_p0 }
   0x8   :  { %597 = shalt.err (!%p594_p2)
}
   0x9   :  { %s598_s8 = scalar_lea.vmem %s31_s22, 128  ;;  %p603_p4 = scmp.lt.s32.totalorder %s31_s22, %s31_s22 }
   0xa   :  { %p599_p3 = scmp.ne.s32.totalorder %s31_s22, %s598_s8  ;;  %p604_p5 = scmp.lt.s32.totalorder %s598_s8, %s598_s8 }
   0xc   :  { %p605_p6 = por %p604_p5, %p603_p4 }
   0xe   :  { %p606_p7 = pnand %p605_p6, %p599_p3 }
  0x10   :  { %609 = shalt.err (!%p606_p7)
}
  0x11   :  { %33 = dma.hbm_to_vmem [thread:$0]  %s780_s1, 128, %s31_s22, [#allocation6]  }
  0x12   :  { %s610_s13 = scalar_lea.hbm %s779_s0, 128 }
  0x13   :  { %p611_p8 = scmp.ne.s32.totalorder %s779_s0, %s610_s13  ;;  %p614_p9 = scmp.lt.u32.totalorder %s610_s13, %s779_s0 }
  0x15   :  { %p616_p10 = pnand %p614_p9, %p611_p8 }
  0x17   :  { %619 = shalt.err (!%p616_p10)
}
  0x18   :  { %s620_s18 = scalar_lea.vmem %s21_s24, 128  ;;  %p625_p12 = scmp.lt.s32.totalorder %s21_s24, %s21_s24 }
  0x19   :  { %p621_p11 = scmp.ne.s32.totalorder %s21_s24, %s620_s18  ;;  %p626_p13 = scmp.lt.s32.totalorder %s620_s18, %s620_s18 }
  0x1b   :  { %p627_p0 = por %p626_p13, %p625_p12 }
  0x1d   :  { %p628_p1 = pnand %p627_p0, %p621_p11 }
  0x1f   :  { %631 = shalt.err (!%p628_p1)
}
  0x20   :  { %23 = dma.hbm_to_vmem [thread:$0]  %s779_s0, 128, %s21_s24, [#allocation4]  }
  0x21   :  { %s660_s20 = smov [#allocation7]   ;;  %s632_s25 = scalar_lea.hbm %s781_s2, 4096 }
  0x22   :  { %s39_s21 = sshll.u32 %s660_s20, 4  ;;  %p633_p2 = scmp.ne.s32.totalorder %s781_s2, %s632_s25  ;;  %s40_s21 = int_to_ptr.vmem [resolvable:$true] %s39_s21 }
  0x23   :  { %p636_p3 = scmp.lt.u32.totalorder %s632_s25, %s781_s2 }
  0x25   :  { %p638_p4 = pnand %p636_p3, %p633_p2 }
  0x27   :  { %641 = shalt.err (!%p638_p4)
}
  0x28   :  { %s642_s30 = scalar_lea.vmem %s40_s21, 4096  ;;  %p647_p6 = scmp.lt.s32.totalorder %s40_s21, %s40_s21 }
  0x29   :  { %p643_p5 = scmp.ne.s32.totalorder %s40_s21, %s642_s30  ;;  %p648_p7 = scmp.lt.s32.totalorder %s642_s30, %s642_s30 }
  0x2b   :  { %p649_p8 = por %p648_p7, %p647_p6 }
  0x2d   :  { %p650_p9 = pnand %p649_p8, %p643_p5 }
  0x2f   :  { %653 = shalt.err (!%p650_p9)
}
  0x30   :  { %s661_s0 = smov 256   ;;  %s662_s24 = smov 16  }
  0x31   :  { %45 = dma.hbm_to_vmem [thread:$0]  %s781_s2, 4096, %s40_s21, [#allocation6], %s661_s0, %s661_s0, %s662_s24  }
  0x32   :  { %654 = dma.done.wait [#allocation4], 128  }
  0x33   :  { %655 = vsyncadd [#allocation4], 4294967168 }
  0x34   :  { %656 = dma.done.wait [#allocation6], 4224  }
  0x35   :  { %657 = vsyncadd [#allocation6], 4294963072  ;;  %v70_v0 = vlaneseq  ;;  %v663_v1 = vmov 1983009808   ;;  %v741_v6 = vld [vmem:[#allocation3] sm:$0xff]  ;;  %v743_v7 = vld [vmem:[#allocation5] sm:$0xff] }
  0x36   :  { %v68_v2 = vunpack.c.l.s4 %v663_v1  ;;  %v64_v8 = vmul.f32 %v741_v6, %v741_v6  ;;  %v99_v9 = vmul.f32 %v743_v7, %v743_v7  ;;  %v532_v10 = vld [vmem:[#allocation7 + $0x4] ss:$16 sps:$4 sm:$0xff]   ;;  %v534_v11 = vld [vmem:[#allocation7] ss:$16 sps:$4 sm:$0xff]   ;;  %vm87_vm0 = vcmask 1041408  }
  0x37   :  { %v736_v3 = vshrl.u32 %v70_v0, 7  ;;  %v535_v12 = vld [vmem:[#allocation7 + $0xc] ss:$16 sps:$4 sm:$0xff]   ;;  %379 = vmatprep.subr.bf16.mxu1 %v532_v10  ;;  %v537_v17 = vld [vmem:[#allocation7 + $0x8] ss:$16 sps:$4 sm:$0xff]   ;;  %vm480_vm1 = vcmask 1024  }
  0x38   :  { %v69_v4 = vunpack.c.0.s8 %v68_v2  ;;  %v66_v13 = vcombine.high %v64_v8, %v64_v8  ;;  %v101_v15 = vcombine.high %v99_v9, %v99_v9  ;;  %380 = vmatpush1.bf16.xpose.msra.mxu1 %v534_v11  ;;  %419 = vmatprep.subr.bf16.mxu0 %v535_v12  ;;  %v538_v18 = vld [vmem:[#allocation7 + $0x24] ss:$16 sps:$4 sm:$0xff]   ;;  %v541_v23 = vld [vmem:[#allocation7 + $0x2c] ss:$16 sps:$4 sm:$0xff]   ;;  %v540_v33 = vld [vmem:[#allocation7 + $0x20] ss:$16 sps:$4 sm:$0xff]  }
  0x39   :  { %420 = vmatpush1.bf16.xpose.msra.mxu0 %v537_v17  ;;  %381 = vmatprep.subr.bf16.mxu1 %v538_v18  ;;  %v543_v34 = vld [vmem:[#allocation7 + $0x28] ss:$16 sps:$4 sm:$0xff]   ;;  %v544_v37 = vld [vmem:[#allocation7 + $0x44] ss:$16 sps:$4 sm:$0xff]   ;;  %v547_v39 = vld [vmem:[#allocation7 + $0x4c] ss:$16 sps:$4 sm:$0xff]  }
  0x3a   :  { %v739_v5 = vsub.s32 %v69_v4, %v736_v3  ;;  %421 = vmatprep.subr.bf16.mxu0 %v541_v23  ;;  %v546_v44 = vld [vmem:[#allocation7 + $0x40] ss:$16 sps:$4 sm:$0xff]   ;;  %v549_v45 = vld [vmem:[#allocation7 + $0x48] ss:$16 sps:$4 sm:$0xff]   ;;  %v550_v46 = vld [vmem:[#allocation7 + $0x64] ss:$16 sps:$4 sm:$0xff]  }
  0x3b   :  { %v553_v47 = vld [vmem:[#allocation7 + $0x6c] ss:$16 sps:$4 sm:$0xff]   ;;  %v552_v48 = vld [vmem:[#allocation7 + $0x60] ss:$16 sps:$4 sm:$0xff]   ;;  %v555_v49 = vld [vmem:[#allocation7 + $0x68] ss:$16 sps:$4 sm:$0xff]  }
  0x3c   :  { %v73_v14 = vrot.slane %v64_v8, %v739_v5  ;;  %v108_v16 = vrot.slane %v99_v9, %v739_v5  ;;  %v80_v19 = vrot.slane %v66_v13, %v739_v5  ;;  %v115_v22 = vrot.slane %v101_v15, %v739_v5  ;;  %v556_v50 = vld [vmem:[#allocation7 + $0x84] ss:$16 sps:$4 sm:$0xff]   ;;  %v559_v51 = vld [vmem:[#allocation7 + $0x8c] ss:$16 sps:$4 sm:$0xff]   ;;  %v558_v52 = vld [vmem:[#allocation7 + $0x80] ss:$16 sps:$4 sm:$0xff]  }
  0x3d   :  { %v561_v53 = vld [vmem:[#allocation7 + $0x88] ss:$16 sps:$4 sm:$0xff]   ;;  %v562_v54 = vld [vmem:[#allocation7 + $0xa4] ss:$16 sps:$4 sm:$0xff]   ;;  %v565_v55 = vld [vmem:[#allocation7 + $0xac] ss:$16 sps:$4 sm:$0xff]  }
  0x3e   :  { %v81_v20 = vcombine.high %v73_v14, %v73_v14  ;;  %v88_v21 = vsel %vm87_vm0, %v73_v14, 0.0  ;;  %v116_v24 = vcombine.high %v108_v16, %v108_v16  ;;  %v122_v25 = vsel %vm87_vm0, %v108_v16, 0.0  ;;  %v564_v56 = vld [vmem:[#allocation7 + $0xa0] ss:$16 sps:$4 sm:$0xff]   ;;  %v567_v57 = vld [vmem:[#allocation7 + $0xa8] ss:$16 sps:$4 sm:$0xff]  }
  0x3f   :  { %v82_v26 = vcombine.high %v80_v19, %v80_v19  ;;  %v91_v28 = vsel %vm87_vm0, %v80_v19, 0.0  ;;  %v117_v29 = vcombine.high %v115_v22, %v115_v22  ;;  %v125_v32 = vsel %vm87_vm0, %v115_v22, 0.0  ;;  %v568_v58 = vld [vmem:[#allocation7 + $0xc4] ss:$16 sps:$4 sm:$0xff]   ;;  %v571_v59 = vld [vmem:[#allocation7 + $0xcc] ss:$16 sps:$4 sm:$0xff]  }
  0x40   :  { %v89_v27 = vsel %vm87_vm0, %v81_v20, 0.0  ;;  %v123_v31 = vsel %vm87_vm0, %v116_v24, 0.0  ;;  %382 = vmatpush1.bf16.xpose.msra.mxu1 %v540_v33  ;;  %v570_v60 = vld [vmem:[#allocation7 + $0xc0] ss:$16 sps:$4 sm:$0xff]   ;;  %v573_v61 = vld [vmem:[#allocation7 + $0xc8] ss:$16 sps:$4 sm:$0xff]  }
  0x41   :  { %v90_v30 = vadd.f32 %v89_v27, %v88_v21  ;;  %v93_v35 = vsel %vm87_vm0, %v82_v26, 0.0  ;;  %v124_v36 = vadd.f32 %v123_v31, %v122_v25  ;;  %v127_v41 = vsel %vm87_vm0, %v117_v29, 0.0  ;;  %422 = vmatpush1.bf16.xpose.msra.mxu0 %v543_v34  ;;  %383 = vmatprep.subr.bf16.mxu1 %v544_v37  ;;  %v574_v62 = vld [vmem:[#allocation7 + $0xe4] ss:$16 sps:$4 sm:$0xff]   ;;  %v577_v63 = vld [vmem:[#allocation7 + $0xec] ss:$16 sps:$4 sm:$0xff]  }
  0x42   :  { %423 = vmatprep.subr.bf16.mxu0 %v547_v39  ;;  %v576_v0 = vld [vmem:[#allocation7 + $0xe0] ss:$16 sps:$4 sm:$0xff]   ;;  %v579_v1 = vld [vmem:[#allocation7 + $0xe8] ss:$16 sps:$4 sm:$0xff]   ;;  %v664_v9 = vmov 269488144  }
  0x43   :  { %v92_v38 = vadd.f32 %v91_v28, %v90_v30  ;;  %v126_v40 = vadd.f32 %v125_v32, %v124_v36  ;;  %v135_v10 = vunpack.c.l.s4 %v664_v9  ;;  %v521_v36 = vld [vmem:[%s783_s4] ss:$0 sm:$0xff] }
  0x45   :  { %v94_v42 = vadd.f32 %v93_v35, %v92_v38  ;;  %v128_v43 = vadd.f32 %v127_v41, %v126_v40  ;;  %v136_v12 = vunpack.c.0.s8 %v135_v10  ;;  %v472_v41 = vstv %s784_s5 }
  0x47   :  { %95 = vadd.xlane.f32.xlu0 %v94_v42  ;;  %v139_v13 = vsub.s32 %v136_v12, %v736_v3 }
  0x48   :  { %384 = vmatpush1.bf16.xpose.msra.mxu1 %v546_v44 }
  0x49   :  { %424 = vmatpush1.bf16.xpose.msra.mxu0 %v549_v45  ;;  %385 = vmatprep.subr.bf16.mxu1 %v550_v46 }
  0x4a   :  { %425 = vmatprep.subr.bf16.mxu0 %v553_v47 }
  0x4b   :  { %129 = vadd.xlane.f32.xlu0 %v128_v43 }
  0x50   :  { %386 = vmatpush1.bf16.xpose.msra.mxu1 %v552_v48 }
  0x51   :  { %426 = vmatpush1.bf16.xpose.msra.mxu0 %v555_v49  ;;  %387 = vmatprep.subr.bf16.mxu1 %v556_v50 }
  0x52   :  { %427 = vmatprep.subr.bf16.mxu0 %v559_v51 }
  0x58   :  { %388 = vmatpush1.bf16.xpose.msra.mxu1 %v558_v52 }
  0x59   :  { %428 = vmatpush1.bf16.xpose.msra.mxu0 %v561_v53  ;;  %389 = vmatprep.subr.bf16.mxu1 %v562_v54 }
  0x5a   :  { %429 = vmatprep.subr.bf16.mxu0 %v565_v55 }
  0x60   :  { %390 = vmatpush1.bf16.xpose.msra.mxu1 %v564_v56 }
  0x61   :  { %430 = vmatpush1.bf16.xpose.msra.mxu0 %v567_v57  ;;  %391 = vmatprep.subr.bf16.mxu1 %v568_v58 }
  0x62   :  { %431 = vmatprep.subr.bf16.mxu0 %v571_v59 }
  0x68   :  { %392 = vmatpush1.bf16.xpose.msra.mxu1 %v570_v60 }
  0x69   :  { %432 = vmatpush1.bf16.xpose.msra.mxu0 %v573_v61  ;;  %393 = vmatprep.subr.bf16.mxu1 %v574_v62 }
  0x6a   :  { %433 = vmatprep.subr.bf16.mxu0 %v577_v63 }
  0x70   :  { %394 = vmatpush1.bf16.xpose.msra.mxu1 %v576_v0 }
  0x71   :  { %434 = vmatpush1.bf16.xpose.msra.mxu0 %v579_v1 }
  0xd4   :  { %v96_v2 = vpop.xlane.xlu0 %95 }
  0xd5   :  { %v97_v4 = vmax.f32 %v96_v2, 1e-24 }
  0xd7   :  { %580 = vrsqrt.f32 %v97_v4 }
  0xd8   :  { %v130_v8 = vpop.xlane.xlu0 %129 }
  0xd9   :  { %v131_v11 = vmax.f32 %v130_v8, 1e-24 }
  0xdb   :  { %582 = vrsqrt.f32 %v131_v11 }
  0xe1   :  { %v581_v14 = vpop.eup %580 }
  0xe2   :  { %v140_v15 = vrot.slane %v581_v14, %v139_v13 }
  0xe4   :  { %v142_v18 = vmul.f32 %v140_v15, %v741_v6  ;;  %v488_v6 = vld [vmem:[%s782_s3] ss:$0 sm:$0xff] }
  0xe5   :  { %v583_v16 = vpop.eup %582 }
  0xe6   :  { %v150_v17 = vrot.slane %v583_v16, %v139_v13 }
  0xe8   :  { %v152_v19 = vmul.f32 %v150_v17, %v743_v7 }
  0xea   :  { %v153_v20 = vsub.f32 %v142_v18, %v152_v19 }
  0xec   :  { %v162_v21 = vrot.slane %v153_v20, %v739_v5  ;;  %v155_v22 = vcombine.high %v153_v20, %v153_v20 }
  0xee   :  { %v170_v23 = vcombine.high %v162_v21, %v162_v21  ;;  %v169_v24 = vrot.slane %v155_v22, %v739_v5  ;;  %v176_v27 = vpack.c.bf16 %v162_v21, %v162_v21 }
  0xf0   :  { %v177_v25 = vpack.c.bf16 %v170_v23, %v170_v23  ;;  %v171_v26 = vcombine.high %v169_v24, %v169_v24  ;;  %v178_v28 = vpack.c.bf16 %v169_v24, %v169_v24 }
  0xf2   :  { %411 = vmatprep.mubr.bf16.mxu1 %v177_v25  ;;  %v179_v3 = vpack.c.bf16 %v171_v26, %v171_v26 }
  0xf3   :  { %412 = vmatmul.mubr.bf16.vlgmr.msra.gmra.mrb[0].mxu1 %v176_v27 }
  0xf4   :  { %451 = vmatprep.mubr.bf16.mxu0 %v179_v3 }
  0xf5   :  { %452 = vmatmul.mubr.bf16.vlgmr.msra.gmra.mrb[0].mxu0 %v178_v28 }
 0x1c6   :  { %v413_v7 = vpop.f32.mrb[0].mxu1 }
 0x1c7   :  { %v414_v29 = vadd.f32 %v488_v6, %v413_v7  ;;  %v415_v30 = vpop.f32.mrb[1].mxu1 }
 0x1c8   :  { %v416_v31 = vpop.f32.mrb[2].mxu1  ;;  %v453_v32 = vpop.f32.mrb[0].mxu0 }
 0x1c9   :  { %v454_v33 = vadd.f32 %v453_v32, %v414_v29  ;;  %v417_v5 = vpop.f32.mrb[3].mxu1  ;;  %v455_v34 = vpop.f32.mrb[1].mxu0 }
 0x1ca   :  { %v456_v35 = vpop.f32.mrb[2].mxu0 }
 0x1cb   :  { %v459_v37 = vmax.f32 %v454_v33, 0.0  ;;  %v457_v38 = vpop.f32.mrb[3].mxu0 }
 0x1cd   :  { %v467_v39 = vmul.f32 %v521_v36, %v459_v37 }
 0x1cf   :  { %v468_v40 = vsel %vm87_vm0, %v467_v39, 0.0 }
 0x1d0   :  { %469 = vadd.xlane.f32.xlu1 %v468_v40 }
 0x25d   :  { %v470_v42 = vpop.xlane.xlu1 %469 }
 0x25e   :  { %v473_v43 = vadd.f32 %v472_v41, %v470_v42 }
 0x260   :  { %v522_v44 = vmul.f32 -1.442695, %v473_v43 }
 0x262   :  { %584 = vpow2.f32 %v522_v44 }
 0x26c   :  { %v585_v45 = vpop.eup %584 }
 0x26d   :  { %v477_v46 = vadd.f32 1.0, %v585_v45 }
 0x26f   :  { %586 = vrcp.f32 %v477_v46 }
 0x279   :  { %v587_v47 = vpop.eup %586 }
 0x27a   :  { %481 = vst.msk [vmem:[%s785_s6] sm:$0x3] %vm480_vm1, %v587_v47 }
 0x27b   :  { %486 = vsyncpa [#allocation4], 1 }
 0x27c   :  { %487 = vsyncpa [#allocation6], 1 }

</bundles_post_ra>
